<compile_context>
chip_gen: v6e
topology: v6e:2x2x1
jax: 0.10.0
libtpu: 0.0.40
codegen_flags: <defaults>
</compile_context>

<pallas_src>
import functools

import jax
import jax.numpy as jnp
import numpy as np
from jax.experimental import pallas as pl
from jax.experimental.pallas import tpu as pltpu


# --------------------------------------------------------------------------- #
# Kernel
# --------------------------------------------------------------------------- #
# Grid = (4 stages, N // TILE node-column tiles); the stage axis is OUTER so
# each stage's full-width scratch is complete before the next stage reads it:
#   stage 0:  T1[:, j]  = Xa @ L^T[:, j]
#   stage 1:  T2_j = T1 @ L^T[:, j];  H[:, j] = relu(W1x Xa_j + W1t1 T1_j + W1t2 T2_j)
#   stage 2:  S1[:, j]  = H  @ L^T[:, j]
#   stage 3:  S2_j = S1 @ L^T[:, j];  out[:, j] = Wyh H_j + Wys1 S1_j + Wys2 S2_j + Wyx Xa_j
# (biases / rezero / residual Linear are folded into the host-prepared weights;
#  out_ref is only written at stage 3 -- earlier sweeps write back stale bytes
#  for the tiny (B*C2, TILE) tile which the final sweep overwrites.)

def resblock_kernel(xa_ref, lt_ref, w1x_ref, w1t1_ref, w1t2_ref,
                    wyh_ref, wys1_ref, wys2_ref, wyx_ref,
                    out_ref, t1_ref, h_ref, s1_ref):
    stage = pl.program_id(0)
    tile = lt_ref.shape[1]
    col = pl.multiple_of(pl.program_id(1) * tile, tile)   # lane offset of this tile
    f32, bf16 = jnp.float32, jnp.bfloat16

    def mm(a, b):                                          # bf16 x bf16 -> f32 on MXU
        return jnp.dot(a, b, preferred_element_type=f32)

    @pl.when(stage == 0)                                   # T1 = Xa @ L^T
    def _():
        t1_ref[:, pl.ds(col, tile)] = mm(xa_ref[...], lt_ref[...]).astype(bf16)

    @pl.when(stage == 1)                                   # ConvBlock1 (bias folded, relu)
    def _():
        t2 = mm(t1_ref[...], lt_ref[...]).astype(bf16)     # T1 @ L^T  (recurrence folded)
        h = (mm(w1x_ref[...], xa_ref[:, pl.ds(col, tile)])
             + mm(w1t1_ref[...], t1_ref[:, pl.ds(col, tile)])
             + mm(w1t2_ref[...], t2))
        h_ref[:, pl.ds(col, tile)] = jnp.maximum(h, 0.0).astype(bf16)

    @pl.when(stage == 2)                                   # S1 = H @ L^T
    def _():
        s1_ref[:, pl.ds(col, tile)] = mm(h_ref[...], lt_ref[...]).astype(bf16)

    @pl.when(stage == 3)                                   # ConvBlock2 + rezero + residual
    def _():
        s2 = mm(s1_ref[...], lt_ref[...]).astype(bf16)
        out_ref[...] = (mm(wyh_ref[...], h_ref[:, pl.ds(col, tile)])
                        + mm(wys1_ref[...], s1_ref[:, pl.ds(col, tile)])
                        + mm(wys2_ref[...], s2)
                        + mm(wyx_ref[...], xa_ref[:, pl.ds(col, tile)]))


# --------------------------------------------------------------------------- #
# One-time parameter packing (hoisted out of the per-step forward)
# --------------------------------------------------------------------------- #

def _round_up(v, m):
    return (v + m - 1) // m * m


def _blockdiag(w_oc, batch):
    """(Cout, Cin) -> (batch*Cout, batch*Cin), block-diagonal over the batch."""
    cout, cin = w_oc.shape
    eye = jnp.eye(batch, dtype=w_oc.dtype)
    blk = eye[:, None, :, None] * w_oc[None, :, None, :]          # (b, o, b', c)
    return blk.reshape(batch * cout, batch * cin)


def _pad_cols(w, total_cols):
    pad = total_cols - w.shape[1]
    return jnp.concatenate([w, jnp.zeros((w.shape[0], pad), w.dtype)], axis=1)


def prepare_resblock_params(L, w1, b1, w2, b2, wres, bres, rezero, batch):
    """Pack static per-model data once: L^T -> bf16, Chebyshev weights fused
    over k (block-diagonal over batch), recurrence constants / rezero / biases
    / residual Linear folded in, everything cast to bf16."""
    K, cin, c1 = w1.shape
    _, _, c2 = w2.shape
    assert K == 3, "kernel specialised for kernel_size=3 (module default)"
    # TODO(synk): general Chebyshev order K != 3 (needs K-1 laplacian stages per ConvBlock).
    rz = jnp.asarray(rezero, jnp.float32).reshape(())
    r_aug = _round_up(batch * cin + 1, 8)          # x rows + ones row, sublane-padded

    # ConvBlock1: basis [T0, T1, T1@L^T] with weights [W0-W2, W1, 2*W2]; bias folded.
    b1_col = jnp.tile(b1, batch)[:, None]
    w1x = _pad_cols(jnp.concatenate(
        [_blockdiag(w1[0].T - w1[2].T, batch), b1_col], axis=1), r_aug)
    w1t1 = _pad_cols(_blockdiag(w1[1].T, batch), r_aug)
    w1t2 = _pad_cols(_blockdiag(2.0 * w1[2].T, batch), r_aug)

    # ConvBlock2 (+ rezero) and residual Linear (+ both biases) folded.
    wyh = rz * _blockdiag(w2[0].T - w2[2].T, batch)
    wys1 = rz * _blockdiag(w2[1].T, batch)
    wys2 = rz * _blockdiag(2.0 * w2[2].T, batch)
    y_bias_col = (rz * jnp.tile(b2, batch) + jnp.tile(bres, batch))[:, None]
    wyx = _pad_cols(jnp.concatenate(
        [_blockdiag(wres.T, batch), y_bias_col], axis=1), r_aug)

    bf = lambda a: a.astype(jnp.bfloat16)
    return dict(lt=bf(jnp.transpose(L)), w1x=bf(w1x), w1t1=bf(w1t1), w1t2=bf(w1t2),
                wyh=bf(wyh), wys1=bf(wys1), wys2=bf(wys2), wyx=bf(wyx))


# --------------------------------------------------------------------------- #
# Forward wrapper
# --------------------------------------------------------------------------- #

def _pick_tile(n, max_tile=512):
    """Largest multiple of 128 that divides n, capped at max_tile lanes."""
    t = min(max_tile, n)
    t -= t % 128
    while t > 128 and n % t != 0:
        t -= 128
    return t


@functools.partial(jax.jit, static_argnames=("tile_n",))
def resblock_forward(x, params, tile_n=None):
    """x: (B, nodes, Cin) float32  ->  (B, nodes, C2) float32 (module layout)."""
    B, N, Cin = x.shape
    assert N % 128 == 0, "node count must be a multiple of 128"
    # TODO(synk): pad nodes / laplacian for node counts that are not multiples of 128.
    c1 = params["w1x"].shape[0] // B
    c2 = params["wyx"].shape[0] // B
    r_aug = params["w1x"].shape[1]
    if tile_n is None:
        tile_n = _pick_tile(N)
    assert N % tile_n == 0 and tile_n % 128 == 0
    n_tiles = N // tile_n

    # Per-call layout plumbing: node-last (lane-dense), batch packed into rows,
    # constant-ones row (bias folding) + zero rows up to the padded row count.
    x_nl = jnp.transpose(x, (0, 2, 1)).reshape(B * Cin, N)
    xa = jnp.concatenate(
        [x_nl, jnp.ones((1, N), x.dtype),
         jnp.zeros((r_aug - B * Cin - 1, N), x.dtype)], axis=0).astype(jnp.bfloat16)

    # Explicit scoped-VMEM budget: streamed L^T slab (double-buffered) +
    # resident x_aug / scratch / output tiles, with 2x headroom.
    est = (2 * N * tile_n * 2                     # L^T slabs
           + 2 * r_aug * N * 2                    # resident x_aug
           + (r_aug + 2 * B * c1) * N * 2         # T1 / H / S1 scratch
           + 2 * _round_up(B * c2, 8) * tile_n * 4  # output tiles
           + (1 << 20))                           # weights + misc
    vmem_limit = int(min(max(2 * est, 8 << 20), 64 << 20))

    full = lambda arr: pl.BlockSpec(arr.shape, lambda s, j: (0, 0))   # resident block

    out2d = pl.pallas_call(
        resblock_kernel,
        out_shape=jax.ShapeDtypeStruct((B * c2, N), jnp.float32),
        grid=(4, n_tiles),                                   # (stage, node tile)
        in_specs=[
            full(xa),                                        # x_aug (resident)
            pl.BlockSpec((N, tile_n), lambda s, j: (0, j)),  # L^T column slabs (streamed)
            full(params["w1x"]), full(params["w1t1"]), full(params["w1t2"]),
            full(params["wyh"]), full(params["wys1"]),
            full(params["wys2"]), full(params["wyx"]),
        ],
        out_specs=pl.BlockSpec((B * c2, tile_n), lambda s, j: (0, j)),
        scratch_shapes=[
            pltpu.VMEM((r_aug, N), jnp.bfloat16),            # T1 (full node width)
            pltpu.VMEM((B * c1, N), jnp.bfloat16),           # H
            pltpu.VMEM((B * c1, N), jnp.bfloat16),           # S1
        ],
        # Both axes sequential: each stage's node tiles fill full-width scratch
        # read by the next stage, so they cannot be sharded across v7x cores.
        compiler_params=pltpu.CompilerParams(
            dimension_semantics=("arbitrary", "arbitrary"),
            vmem_limit_bytes=vmem_limit),
    )(xa, params["lt"], params["w1x"], params["w1t1"], params["w1t2"],
      params["wyh"], params["wys1"], params["wys2"], params["wyx"])

    # Lane-dense (B*C2, N) kernel layout -> module layout (B, nodes, C2).
    return jnp.transpose(out2d.reshape(B, c2, N), (0, 2, 1))


# --------------------------------------------------------------------------- #
# Pure-JAX float32 reference (PyTorch ResBlock semantics)
# --------------------------------------------------------------------------- #

def resblock_ref(x, L, w1, b1, w2, b2, wres, bres, rezero):
    hi = jax.lax.Precision.HIGHEST

    def chebconv(xb, w):
        K = w.shape[0]
        t_prev, t_cur = None, xb
        y = jnp.einsum('bnc,co->bno', xb, w[0], precision=hi)
        for k in range(1, K):
            t_new = jnp.einsum('nm,bmc->bnc', L, t_cur, precision=hi)
            if k > 1:
                t_new = 2.0 * t_new - t_prev
            y = y + jnp.einsum('bnc,co->bno', t_new, w[k], precision=hi)
            t_prev, t_cur = t_cur, t_new
        return y

    h = jnp.maximum(chebconv(x, w1) + b1, 0.0)          # ConvBlock1 (relu)
    y = chebconv(h, w2) + b2                            # ConvBlock2 (no activation)
    res = jnp.einsum('bnc,co->bno', x, wres, precision=hi) + bres
    return rezero * y + res


# --------------------------------------------------------------------------- #
# Main
# --------------------------------------------------------------------------- #

if __name__ == "__main__":
    key = jax.random.PRNGKey(0)
    B, N = 2, 512                 # batch, graph nodes (multiple of 128)
    Cin, C1, C2 = 4, 8, 6         # in_channels, out_channels = (8, 6)
    K = 3                         # Chebyshev kernel_size

    keys = jax.random.split(key, 8)
    x = jax.random.normal(keys[0], (B, N, Cin), dtype=jnp.float32)

    # Deterministic synthetic symmetric (rescaled) "laplacian", kept tame.
    A = jax.random.normal(keys[1], (N, N), dtype=jnp.float32)
    L = (A + A.T) / (2.0 * jnp.sqrt(jnp.float32(N)))

    w1 = jax.random.normal(keys[2], (K, Cin, C1), dtype=jnp.float32) * 0.1
    b1 = jax.random.normal(keys[3], (C1,), dtype=jnp.float32) * 0.1
    w2 = jax.random.normal(keys[4], (K, C1, C2), dtype=jnp.float32) * 0.1
    b2 = jax.random.normal(keys[5], (C2,), dtype=jnp.float32) * 0.1
    wres = jax.random.normal(keys[6], (Cin, C2), dtype=jnp.float32) * 0.1
    bres = jax.random.normal(keys[7], (C2,), dtype=jnp.float32) * 0.1
    # NOTE: PyTorch initialises rezero_weight to 0; use 0.5 so the Chebyshev
    # path actually contributes to the checked output.
    rezero = jnp.array(0.5, dtype=jnp.float32)

    # One-time packing (hoisted out of the per-step forward).
    params = prepare_resblock_params(L, w1, b1, w2, b2, wres, bres, rezero, batch=B)

    out = resblock_forward(x, params, tile_n=128)     # grid = (4 stages, 4 node tiles)
    out = jax.block_until_ready(out)

    ref = resblock_ref(x, L, w1, b1, w2, b2, wres, bres, rezero)
    # Kernel runs bf16 operands on the MXU (f32 accumulation); the reference is
    # full f32 (PyTorch semantics), so allow a bf16-sized tolerance.
    np.testing.assert_allclose(np.asarray(out), np.asarray(ref), rtol=5e-2, atol=5e-2)

    print("KERNEL_OK")
</pallas_src>

<mosaic_0001>
module attributes {stable_mosaic.version = 11 : i64} {
  func.func @resblock_kernel(%arg0: i32, %arg1: i32, %arg2: memref<16x512xbf16, #tpu.memory_space<vmem>>, %arg3: memref<512x128xbf16, #tpu.memory_space<vmem>>, %arg4: memref<16x16xbf16, #tpu.memory_space<vmem>>, %arg5: memref<16x16xbf16, #tpu.memory_space<vmem>>, %arg6: memref<16x16xbf16, #tpu.memory_space<vmem>>, %arg7: memref<12x16xbf16, #tpu.memory_space<vmem>>, %arg8: memref<12x16xbf16, #tpu.memory_space<vmem>>, %arg9: memref<12x16xbf16, #tpu.memory_space<vmem>>, %arg10: memref<12x16xbf16, #tpu.memory_space<vmem>>, %arg11: memref<12x128xf32, #tpu.memory_space<vmem>>, %arg12: memref<16x512xbf16, #tpu.memory_space<vmem>>, %arg13: memref<16x512xbf16, #tpu.memory_space<vmem>>, %arg14: memref<16x512xbf16, #tpu.memory_space<vmem>>) attributes {dimension_semantics = [#tpu.dimension_semantics<arbitrary>, #tpu.dimension_semantics<arbitrary>], iteration_bounds = array<i64: 4, 4>, scalar_prefetch = 0 : i64, scratch_operands = 3 : i64, tpu.core_type = #tpu.core_type<tc>, window_params = [{pipeline_mode = #tpu.pipeline_mode<synchronous>, transform_indices = @transform_0, window_bounds = array<i64: 16, 512>}, {transform_indices = @transform_1, window_bounds = array<i64: 512, 128>}, {pipeline_mode = #tpu.pipeline_mode<synchronous>, transform_indices = @transform_2, window_bounds = array<i64: 16, 16>}, {pipeline_mode = #tpu.pipeline_mode<synchronous>, transform_indices = @transform_3, window_bounds = array<i64: 16, 16>}, {pipeline_mode = #tpu.pipeline_mode<synchronous>, transform_indices = @transform_4, window_bounds = array<i64: 16, 16>}, {pipeline_mode = #tpu.pipeline_mode<synchronous>, transform_indices = @transform_5, window_bounds = array<i64: 12, 16>}, {pipeline_mode = #tpu.pipeline_mode<synchronous>, transform_indices = @transform_6, window_bounds = array<i64: 12, 16>}, {pipeline_mode = #tpu.pipeline_mode<synchronous>, transform_indices = @transform_7, window_bounds = array<i64: 12, 16>}, {pipeline_mode = #tpu.pipeline_mode<synchronous>, transform_indices = @transform_8, window_bounds = array<i64: 12, 16>}, {transform_indices = @transform_9, window_bounds = array<i64: 12, 128>}]} {
    %c128_i32 = arith.constant 128 : i32
    %0 = arith.muli %arg1, %c128_i32 : i32
    %1 = tpu.assume_multiple %0, 128 : i32
    %c0_i32 = arith.constant 0 : i32
    %2 = arith.cmpi eq, %arg0, %c0_i32 : i32
    %3 = arith.extui %2 : i1 to i32
    %c0_i32_0 = arith.constant 0 : i32
    %4 = arith.cmpi ne, %3, %c0_i32_0 : i32
    scf.if %4 {
      %c0 = arith.constant 0 : index
      %c0_4 = arith.constant 0 : index
      %14 = vector.load %arg2[%c0, %c0_4] : memref<16x512xbf16, #tpu.memory_space<vmem>>, vector<16x512xbf16>
      %c0_5 = arith.constant 0 : index
      %c0_6 = arith.constant 0 : index
      %15 = vector.load %arg3[%c0_5, %c0_6] : memref<512x128xbf16, #tpu.memory_space<vmem>>, vector<512x128xbf16>
      %cst = arith.constant dense<0.000000e+00> : vector<16x128xf32>
      %16 = tpu.matmul %14, %15, %cst {dimension_numbers = #tpu.dot_dimension_numbers<[1], [0], [0], [1], [0, 0, 1, 1], [], []>} : vector<16x512xbf16>, vector<512x128xbf16>, vector<16x128xf32> -> vector<16x128xf32>
      %17 = arith.truncf %16 : vector<16x128xf32> to vector<16x128xbf16>
      %c0_7 = arith.constant 0 : index
      %18 = arith.index_cast %1 : i32 to index
      %19 = vector.load %arg12[%c0_7, %18] : memref<16x512xbf16, #tpu.memory_space<vmem>>, vector<16x128xbf16>
      tpu.vector_store %arg12[%c0_7, %18], %17 {strides = array<i32>} : memref<16x512xbf16, #tpu.memory_space<vmem>>, vector<16x128xbf16>,
    } else {
    }
    %c1_i32 = arith.constant 1 : i32
    %5 = arith.cmpi eq, %arg0, %c1_i32 : i32
    %6 = arith.extui %5 : i1 to i32
    %c0_i32_1 = arith.constant 0 : i32
    %7 = arith.cmpi ne, %6, %c0_i32_1 : i32
    scf.if %7 {
      %c0 = arith.constant 0 : index
      %c0_4 = arith.constant 0 : index
      %14 = vector.load %arg12[%c0, %c0_4] : memref<16x512xbf16, #tpu.memory_space<vmem>>, vector<16x512xbf16>
      %c0_5 = arith.constant 0 : index
      %c0_6 = arith.constant 0 : index
      %15 = vector.load %arg3[%c0_5, %c0_6] : memref<512x128xbf16, #tpu.memory_space<vmem>>, vector<512x128xbf16>
      %cst = arith.constant dense<0.000000e+00> : vector<16x128xf32>
      %16 = tpu.matmul %14, %15, %cst {dimension_numbers = #tpu.dot_dimension_numbers<[1], [0], [0], [1], [0, 0, 1, 1], [], []>} : vector<16x512xbf16>, vector<512x128xbf16>, vector<16x128xf32> -> vector<16x128xf32>
      %17 = arith.truncf %16 : vector<16x128xf32> to vector<16x128xbf16>
      %c0_7 = arith.constant 0 : index
      %c0_8 = arith.constant 0 : index
      %18 = vector.load %arg4[%c0_7, %c0_8] : memref<16x16xbf16, #tpu.memory_space<vmem>>, vector<16x16xbf16>
      %c0_9 = arith.constant 0 : index
      %19 = arith.index_cast %1 : i32 to index
      %20 = vector.load %arg2[%c0_9, %19] : memref<16x512xbf16, #tpu.memory_space<vmem>>, vector<16x128xbf16>
      %cst_10 = arith.constant dense<0.000000e+00> : vector<16x128xf32>
      %21 = tpu.matmul %18, %20, %cst_10 {dimension_numbers = #tpu.dot_dimension_numbers<[1], [0], [0], [1], [0, 0, 1, 1], [], []>} : vector<16x16xbf16>, vector<16x128xbf16>, vector<16x128xf32> -> vector<16x128xf32>
      %c0_11 = arith.constant 0 : index
      %c0_12 = arith.constant 0 : index
      %22 = vector.load %arg5[%c0_11, %c0_12] : memref<16x16xbf16, #tpu.memory_space<vmem>>, vector<16x16xbf16>
      %c0_13 = arith.constant 0 : index
      %23 = arith.index_cast %1 : i32 to index
      %24 = vector.load %arg12[%c0_13, %23] : memref<16x512xbf16, #tpu.memory_space<vmem>>, vector<16x128xbf16>
      %cst_14 = arith.constant dense<0.000000e+00> : vector<16x128xf32>
      %25 = tpu.matmul %22, %24, %cst_14 {dimension_numbers = #tpu.dot_dimension_numbers<[1], [0], [0], [1], [0, 0, 1, 1], [], []>} : vector<16x16xbf16>, vector<16x128xbf16>, vector<16x128xf32> -> vector<16x128xf32>
      %26 = arith.addf %21, %25 : vector<16x128xf32>
      %c0_15 = arith.constant 0 : index
      %c0_16 = arith.constant 0 : index
      %27 = vector.load %arg6[%c0_15, %c0_16] : memref<16x16xbf16, #tpu.memory_space<vmem>>, vector<16x16xbf16>
      %cst_17 = arith.constant dense<0.000000e+00> : vector<16x128xf32>
      %28 = tpu.matmul %27, %17, %cst_17 {dimension_numbers = #tpu.dot_dimension_numbers<[1], [0], [0], [1], [0, 0, 1, 1], [], []>} : vector<16x16xbf16>, vector<16x128xbf16>, vector<16x128xf32> -> vector<16x128xf32>
      %29 = arith.addf %26, %28 : vector<16x128xf32>
      %cst_18 = arith.constant 0.000000e+00 : f32
      %30 = vector.broadcast %cst_18 : f32 to vector<16x128xf32>
      %31 = arith.maximumf %29, %30 : vector<16x128xf32>
      %32 = arith.truncf %31 : vector<16x128xf32> to vector<16x128xbf16>
      %c0_19 = arith.constant 0 : index
      %33 = arith.index_cast %1 : i32 to index
      %34 = vector.load %arg13[%c0_19, %33] : memref<16x512xbf16, #tpu.memory_space<vmem>>, vector<16x128xbf16>
      tpu.vector_store %arg13[%c0_19, %33], %32 {strides = array<i32>} : memref<16x512xbf16, #tpu.memory_space<vmem>>, vector<16x128xbf16>,
    } else {
    }
    %c2_i32 = arith.constant 2 : i32
    %8 = arith.cmpi eq, %arg0, %c2_i32 : i32
    %9 = arith.extui %8 : i1 to i32
    %c0_i32_2 = arith.constant 0 : i32
    %10 = arith.cmpi ne, %9, %c0_i32_2 : i32
    scf.if %10 {
      %c0 = arith.constant 0 : index
      %c0_4 = arith.constant 0 : index
      %14 = vector.load %arg13[%c0, %c0_4] : memref<16x512xbf16, #tpu.memory_space<vmem>>, vector<16x512xbf16>
      %c0_5 = arith.constant 0 : index
      %c0_6 = arith.constant 0 : index
      %15 = vector.load %arg3[%c0_5, %c0_6] : memref<512x128xbf16, #tpu.memory_space<vmem>>, vector<512x128xbf16>
      %cst = arith.constant dense<0.000000e+00> : vector<16x128xf32>
      %16 = tpu.matmul %14, %15, %cst {dimension_numbers = #tpu.dot_dimension_numbers<[1], [0], [0], [1], [0, 0, 1, 1], [], []>} : vector<16x512xbf16>, vector<512x128xbf16>, vector<16x128xf32> -> vector<16x128xf32>
      %17 = arith.truncf %16 : vector<16x128xf32> to vector<16x128xbf16>
      %c0_7 = arith.constant 0 : index
      %18 = arith.index_cast %1 : i32 to index
      %19 = vector.load %arg14[%c0_7, %18] : memref<16x512xbf16, #tpu.memory_space<vmem>>, vector<16x128xbf16>
      tpu.vector_store %arg14[%c0_7, %18], %17 {strides = array<i32>} : memref<16x512xbf16, #tpu.memory_space<vmem>>, vector<16x128xbf16>,
    } else {
    }
    %c3_i32 = arith.constant 3 : i32
    %11 = arith.cmpi eq, %arg0, %c3_i32 : i32
    %12 = arith.extui %11 : i1 to i32
    %c0_i32_3 = arith.constant 0 : i32
    %13 = arith.cmpi ne, %12, %c0_i32_3 : i32
    scf.if %13 {
      %c0 = arith.constant 0 : index
      %c0_4 = arith.constant 0 : index
      %14 = vector.load %arg14[%c0, %c0_4] : memref<16x512xbf16, #tpu.memory_space<vmem>>, vector<16x512xbf16>
      %c0_5 = arith.constant 0 : index
      %c0_6 = arith.constant 0 : index
      %15 = vector.load %arg3[%c0_5, %c0_6] : memref<512x128xbf16, #tpu.memory_space<vmem>>, vector<512x128xbf16>
      %cst = arith.constant dense<0.000000e+00> : vector<16x128xf32>
      %16 = tpu.matmul %14, %15, %cst {dimension_numbers = #tpu.dot_dimension_numbers<[1], [0], [0], [1], [0, 0, 1, 1], [], []>} : vector<16x512xbf16>, vector<512x128xbf16>, vector<16x128xf32> -> vector<16x128xf32>
      %17 = arith.truncf %16 : vector<16x128xf32> to vector<16x128xbf16>
      %c0_7 = arith.constant 0 : index
      %c0_8 = arith.constant 0 : index
      %18 = vector.load %arg7[%c0_7, %c0_8] : memref<12x16xbf16, #tpu.memory_space<vmem>>, vector<12x16xbf16>
      %c0_9 = arith.constant 0 : index
      %19 = arith.index_cast %1 : i32 to index
      %20 = vector.load %arg13[%c0_9, %19] : memref<16x512xbf16, #tpu.memory_space<vmem>>, vector<16x128xbf16>
      %cst_10 = arith.constant dense<0.000000e+00> : vector<12x128xf32>
      %21 = tpu.matmul %18, %20, %cst_10 {dimension_numbers = #tpu.dot_dimension_numbers<[1], [0], [0], [1], [0, 0, 1, 1], [], []>} : vector<12x16xbf16>, vector<16x128xbf16>, vector<12x128xf32> -> vector<12x128xf32>
      %c0_11 = arith.constant 0 : index
      %c0_12 = arith.constant 0 : index
      %22 = vector.load %arg8[%c0_11, %c0_12] : memref<12x16xbf16, #tpu.memory_space<vmem>>, vector<12x16xbf16>
      %c0_13 = arith.constant 0 : index
      %23 = arith.index_cast %1 : i32 to index
      %24 = vector.load %arg14[%c0_13, %23] : memref<16x512xbf16, #tpu.memory_space<vmem>>, vector<16x128xbf16>
      %cst_14 = arith.constant dense<0.000000e+00> : vector<12x128xf32>
      %25 = tpu.matmul %22, %24, %cst_14 {dimension_numbers = #tpu.dot_dimension_numbers<[1], [0], [0], [1], [0, 0, 1, 1], [], []>} : vector<12x16xbf16>, vector<16x128xbf16>, vector<12x128xf32> -> vector<12x128xf32>
      %26 = arith.addf %21, %25 : vector<12x128xf32>
      %c0_15 = arith.constant 0 : index
      %c0_16 = arith.constant 0 : index
      %27 = vector.load %arg9[%c0_15, %c0_16] : memref<12x16xbf16, #tpu.memory_space<vmem>>, vector<12x16xbf16>
      %cst_17 = arith.constant dense<0.000000e+00> : vector<12x128xf32>
      %28 = tpu.matmul %27, %17, %cst_17 {dimension_numbers = #tpu.dot_dimension_numbers<[1], [0], [0], [1], [0, 0, 1, 1], [], []>} : vector<12x16xbf16>, vector<16x128xbf16>, vector<12x128xf32> -> vector<12x128xf32>
      %29 = arith.addf %26, %28 : vector<12x128xf32>
      %c0_18 = arith.constant 0 : index
      %c0_19 = arith.constant 0 : index
      %30 = vector.load %arg10[%c0_18, %c0_19] : memref<12x16xbf16, #tpu.memory_space<vmem>>, vector<12x16xbf16>
      %c0_20 = arith.constant 0 : index
      %31 = arith.index_cast %1 : i32 to index
      %32 = vector.load %arg2[%c0_20, %31] : memref<16x512xbf16, #tpu.memory_space<vmem>>, vector<16x128xbf16>
      %cst_21 = arith.constant dense<0.000000e+00> : vector<12x128xf32>
      %33 = tpu.matmul %30, %32, %cst_21 {dimension_numbers = #tpu.dot_dimension_numbers<[1], [0], [0], [1], [0, 0, 1, 1], [], []>} : vector<12x16xbf16>, vector<16x128xbf16>, vector<12x128xf32> -> vector<12x128xf32>
      %34 = arith.addf %29, %33 : vector<12x128xf32>
      %c0_22 = arith.constant 0 : index
      %c0_23 = arith.constant 0 : index
      %35 = vector.load %arg11[%c0_22, %c0_23] : memref<12x128xf32, #tpu.memory_space<vmem>>, vector<12x128xf32>
      tpu.vector_store %arg11[%c0_22, %c0_23], %34 {strides = array<i32>} : memref<12x128xf32, #tpu.memory_space<vmem>>, vector<12x128xf32>,
    } else {
    }
    return
  }
  func.func @transform_0(%arg0: i32, %arg1: i32) -> (i32, i32) {
    %c0_i32 = arith.constant 0 : i32
    %c0_i32_0 = arith.constant 0 : i32
    %c0_i32_1 = arith.constant 0 : i32
    return %c0_i32, %c0_i32_0 : i32, i32
  }
  func.func @transform_1(%arg0: i32, %arg1: i32) -> (i32, i32) {
    %c0_i32 = arith.constant 0 : i32
    %c0_i32_0 = arith.constant 0 : i32
    return %c0_i32, %arg1 : i32, i32
  }
  func.func @transform_2(%arg0: i32, %arg1: i32) -> (i32, i32) {
    %c0_i32 = arith.constant 0 : i32
    %c0_i32_0 = arith.constant 0 : i32
    %c0_i32_1 = arith.constant 0 : i32
    return %c0_i32, %c0_i32_0 : i32, i32
  }
  func.func @transform_3(%arg0: i32, %arg1: i32) -> (i32, i32) {
    %c0_i32 = arith.constant 0 : i32
    %c0_i32_0 = arith.constant 0 : i32
    %c0_i32_1 = arith.constant 0 : i32
    return %c0_i32, %c0_i32_0 : i32, i32
  }
  func.func @transform_4(%arg0: i32, %arg1: i32) -> (i32, i32) {
    %c0_i32 = arith.constant 0 : i32
    %c0_i32_0 = arith.constant 0 : i32
    %c0_i32_1 = arith.constant 0 : i32
    return %c0_i32, %c0_i32_0 : i32, i32
  }
  func.func @transform_5(%arg0: i32, %arg1: i32) -> (i32, i32) {
    %c0_i32 = arith.constant 0 : i32
    %c0_i32_0 = arith.constant 0 : i32
    %c0_i32_1 = arith.constant 0 : i32
    return %c0_i32, %c0_i32_0 : i32, i32
  }
  func.func @transform_6(%arg0: i32, %arg1: i32) -> (i32, i32) {
    %c0_i32 = arith.constant 0 : i32
    %c0_i32_0 = arith.constant 0 : i32
    %c0_i32_1 = arith.constant 0 : i32
    return %c0_i32, %c0_i32_0 : i32, i32
  }
  func.func @transform_7(%arg0: i32, %arg1: i32) -> (i32, i32) {
    %c0_i32 = arith.constant 0 : i32
    %c0_i32_0 = arith.constant 0 : i32
    %c0_i32_1 = arith.constant 0 : i32
    return %c0_i32, %c0_i32_0 : i32, i32
  }
  func.func @transform_8(%arg0: i32, %arg1: i32) -> (i32, i32) {
    %c0_i32 = arith.constant 0 : i32
    %c0_i32_0 = arith.constant 0 : i32
    %c0_i32_1 = arith.constant 0 : i32
    return %c0_i32, %c0_i32_0 : i32, i32
  }
  func.func @transform_9(%arg0: i32, %arg1: i32) -> (i32, i32) {
    %c0_i32 = arith.constant 0 : i32
    %c0_i32_0 = arith.constant 0 : i32
    return %c0_i32, %arg1 : i32, i32
  }
}

</mosaic_0001>

<bundles_post_ra>
// kernel: resblock_forward.1
= control target key start
LH: loop header
LB: loop body
LE: loop exit
PB: predicated region body
PF: predicated region fallthrough
CT: control target
= control target key end

     0   :  { %14 = vsyncpa [#allocation6], 0  ;;  %s3580_s0 = inlined_call_operand.vmem [shape: bf16[16,512], index: 0, kind: input, shape index: {}]   ;;  %s3581_s1 = inlined_call_operand.hbm [shape: bf16[512,512], index: 1, kind: input, shape index: {}]   ;;  %s3582_s2 = inlined_call_operand.vmem [shape: bf16[16,16], index: 2, kind: input, shape index: {}]   ;;  %s3583_s3 = inlined_call_operand.vmem [shape: bf16[16,16], index: 3, kind: input, shape index: {}]   ;;  %s3584_s4 = inlined_call_operand.vmem [shape: bf16[16,16], index: 4, kind: input, shape index: {}]   ;;  %s3585_s5 = inlined_call_operand.vmem [shape: bf16[12,16], index: 5, kind: input, shape index: {}]   ;;  %s3586_s6 = inlined_call_operand.vmem [shape: bf16[12,16], index: 6, kind: input, shape index: {}]   ;;  %s3587_s7 = inlined_call_operand.vmem [shape: bf16[12,16], index: 7, kind: input, shape index: {}]   ;;  %s3588_s8 = inlined_call_operand.vmem [shape: bf16[12,16], index: 8, kind: input, shape index: {}]   ;;  %s3589_s9 = inlined_call_operand.vmem [shape: f32[12,512], index: 9, kind: output, shape index: {}]  }
   0x1   :  { %16 = vsyncpa [#allocation6 + $0x1], 0  ;;  %s3253_s30 = smov 0   ;;  %s3255_s10 = smov 0  }
   0x2   :  { %s3257_s11 = smov 0   ;;  %s3259_s12 = smov 0  }
   0x3   :  { %s3261_s13 = smov 0   ;;  %s3263_s14 = smov 0  }
   0x4   :  { %s3265_s15 = smov 0   ;;  %s3267_s16 = smov 0  }
   0x5 LB: > { %3593 = sst [smem:[#allocation9_spill]] %s3185_s14  ;;  %s2424_s17 = sadd.s32 4294967295, %s3193_s16   ;;  %s3193_s16 = sphi %s3267_s16, %s22_s16   ;;  %s3189_s15 = sphi %s3265_s15, %s3604_s15   ;;  %s3185_s14 = sphi %s3263_s14, %s3603_s14   ;;  %s3181_s13 = sphi %s3261_s13, %s3602_s13   ;;  %s3177_s12 = sphi %s3259_s12, %s3601_s12   ;;  %s3173_s11 = sphi %s3257_s11, %s3607_s11   ;;  %s3169_s10 = sphi %s3255_s10, %s3606_s10   ;;  %s3165_s30 = sphi %s3253_s30, %s3605_s30  }
   0x6   : > { %3594 = sst [smem:[#allocation10_spill]] %s3189_s15  ;;  %s31_s18 = sadd.s32 1, %s3185_s14 }
   0x7   : > { %p32_p0 = scmp.ge.s32.totalorder %s31_s18, 4  ;;  %s34_s19 = sadd.s32 1, %s3189_s15 }
   0x8   : > { %s62_s20 = sadd.s32 1, %s3173_s11  ;;  %p69_p1 = scmp.ne.s32.totalorder %s3173_s11, %s3169_s10 }
   0x9   : > { %s3609_s18 = smov (%p32_p0, %s31_s18), 0  ;;  %s3611_s19 = smov (!%p32_p0, %s34_s19), %s3189_s15 }
   0xa   : > { %3595 = sst [smem:[#allocation11_spill]] %s3609_s18  ;;  %s59_s21 = ssub.s32 %s3185_s14, %s3609_s18 }
   0xb   : > { %p70_p2 = scmp.eq.s32.totalorder %s3193_s16, 0  ;;  %p36_p3 = scmp.ge.s32.totalorder %s3611_s19, 4 }
   0xc   : > { %p60_p4 = scmp.eq.s32.totalorder %s59_s21, 0  ;;  %p75_p6 = scmp.ne.s32.totalorder %s3169_s10, %s3165_s30 }
   0xd   : > { %p3306_p5 = por %p70_p2, %p69_p1  ;;  %s3613_s19 = smov (%p36_p3, %s3611_s19), 0 }
   0xe   : > { %3597 = sst [smem:[#allocation12_spill]] %s3613_s19  ;;  %p76_p7 = scmp.eq.s32.totalorder %s2424_s17, 0 }
   0xf   : > { %s3314_s23 = scalar_select %p60_p4, %s3173_s11, %s62_s20  }
  0x10   : > { %p246_p8 = scmp.eq.s32.totalorder %s2424_s17, 15  ;;  %p2863_p9 = scmp.lt.s32.totalorder %s3193_s16, 16 }
  0x11   : > { %p3317_p10 = por %p76_p7, %p75_p6  ;;  %s296_s26 = sand.u32 1, %s3173_s11  }
  0x12   : > { %p3324_p11 = por %p246_p8, %p69_p1  ;;  %s2429_s27 = sshll.u32 %s3185_s14, 6 }
  0x13   : > { %s2428_s28 = sshll.u32 %s296_s26, 8  ;;  %s305_s20 = scalar_lea.hbm %s3581_s1, %s2429_s27 }
  0x14   : > { %s300_s21 = scalar_lea.vmem [#allocation5], %s2428_s28  ;;  %p3335_p12 = pnand %p2863_p9, %p3306_p5 }
  0x15   : > { %s306_s19 = sshll.u32 %s300_s21, 4  ;;  %p2430_p13 = scmp.ge.s32.totalorder %s3193_s16, 1  ;;  %s307_s19 = int_to_ptr.vmem [resolvable:$true] %s306_s19 }
  0x16   : > { %s297_s18 = scalar_lea.sflag [#allocation6], %s296_s26  ;;  %p3101_p0 = pneg %p3335_p12 }
  0x17   : > { %s3112_s15 = scalar_lea.vmem %s307_s19, 4096  ;;  %s3195_s14 = smov [#allocation5]  }
  0x18   : > { %p3113_p1 = scmp.ne.s32.totalorder %s307_s19, %s3112_s15  ;;  %s3117_s29 = sshll.u32 %s3195_s14, 4  ;;  %s3118_s29 = int_to_ptr.vmem [resolvable:$false] %s3117_s29 }
  0x19   : > { %s3119_s27 = scalar_lea.vmem %s3118_s29, 8192  ;;  %p3120_p4 = scmp.lt.s32.totalorder %s307_s19, %s3118_s29 }
  0x1a   : > { %p3115_p2 = pnand %p3113_p1, %p3101_p0  ;;  %p3121_p6 = scmp.lt.s32.totalorder %s3119_s27, %s3112_s15 }
  0x1c   : > { %p3116_p3 = pneg %p3115_p2  ;;  %p3122_p5 = por %p3121_p6, %p3120_p4 }
  0x1e   : > { %p3123_p7 = pnand %p3122_p5, %p3116_p3 }
  0x20   : > { %3126 = shalt.err (!%p3123_p7)
}
  0x21   : > { %s3196_s22 = smov 256   ;;  %s3197_s26 = smov 64  }
  0x22   : > { %s3198_s28 = smov 4   ;;  %p314_p8 = scmp.lt.s32.totalorder %s3193_s16, 17 }
  0x23   : > { %2862 = dma.hbm_to_vmem [thread:$0]  (!%p3335_p12), %s305_s20, 4096, %s307_s19, %s297_s18, %s3196_s22, %s3197_s26, %s3198_s28  }
  0x24   : > { %p315_p9 = pnand %p2430_p13, %p314_p8 }
  0x25   : > { %s320_s14 = sand.u32 (!%p315_p9), 1, %s3169_s10  }
  0x26   : > { %318 = sbr.rel (%p315_p9) target bundleno = 1455 (0x5af), region = 56  ;;  %s2431_s30 = sshll.u32 (!%p315_p9), %s320_s14, 8 }
  0x27   : > { %s321_s15 = scalar_lea.sflag (!%p315_p9), [#allocation6], %s320_s14  ;;  %s3348_s21 = scalar_lea.vmem (!%p315_p9), [#allocation5], %s2431_s30 }
  0x2b   : > { %3160 = dma.done.wait (%p3317_p10), %s321_s15, 4096  }
  0x2c   : > { %3162 = vsyncadd (%p3317_p10), %s321_s15, 4294963200  ;;  %s2432_s29 = sshll.u32 %s320_s14, 4  ;;  %s3355_s17 = sshll.u32 %s3177_s12, 7 }
  0x2d   : > { %s3357_s18 = scalar_lea.vmem [#allocation7], %s2432_s29  ;;  %p2434_p12 = scmp.ne.s32.totalorder %s3181_s13, 0 }
  0x2e   : > { %s734_s30 = sshra.s32 (!%p2434_p12), %s3355_s17, 7 }
  0x2f   : > { %363 = sbr.rel (%p2434_p12) target bundleno = 293 (0x125), region = 64  ;;  %s2473_s15 = sshll.u32 (!%p2434_p12), %s734_s30, 2 }
  0x30   : > { %s737_s29 = scalar_lea.vmem (!%p2434_p12), [#allocation2], %s2473_s15 }
  0x34   : > { %v2935_v0 = vld [vmem:[%s3348_s21 + $0x78] sm:$0xff]   ;;  %v2939_v4 = vld [vmem:[%s3348_s21 + $0x70] sm:$0xff]   ;;  %v2943_v8 = vld [vmem:[%s3348_s21 + $0x68] sm:$0xff]  }
  0x35   : > { %v2936_v1 = vld [vmem:[%s3348_s21 + $0xf8] sm:$0xff]   ;;  %2625 = vmatprep.subr.bf16.mxu0 %v2935_v0  ;;  %v2940_v5 = vld [vmem:[%s3348_s21 + $0xf0] sm:$0xff]   ;;  %v2944_v9 = vld [vmem:[%s3348_s21 + $0xe8] sm:$0xff]  }
  0x36   : > { %v2937_v2 = vld [vmem:[%s3348_s21 + $0x38] sm:$0xff]   ;;  %2647 = vmatprep.subr.bf16.mxu1 %v2936_v1  ;;  %v2941_v6 = vld [vmem:[%s3348_s21 + $0x30] sm:$0xff]   ;;  %v2945_v10 = vld [vmem:[%s3348_s21 + $0x28] sm:$0xff]  }
  0x37   : > { %v2938_v3 = vld [vmem:[%s3348_s21 + $0xb8] sm:$0xff]   ;;  %2626 = vmatpush3.bf16.msra.mxu0 %v2937_v2  ;;  %v2942_v7 = vld [vmem:[%s3348_s21 + $0xb0] sm:$0xff]   ;;  %v2946_v11 = vld [vmem:[%s3348_s21 + $0xa8] sm:$0xff]  }
  0x38   : > { %2648 = vmatpush3.bf16.msra.mxu1 %v2938_v3  ;;  %2627 = vmatprep.subr.bf16.mxu0 %v2939_v4  ;;  %v2947_v12 = vld [vmem:[%s3348_s21 + $0x60] sm:$0xff]   ;;  %v2951_v16 = vld [vmem:[%s3348_s21 + $0x58] sm:$0xff]   ;;  %v2955_v20 = vld [vmem:[%s3348_s21 + $0x50] sm:$0xff]  }
  0x39   : > { %2649 = vmatprep.subr.bf16.mxu1 %v2940_v5  ;;  %v2948_v13 = vld [vmem:[%s3348_s21 + $0xe0] sm:$0xff]   ;;  %v2952_v17 = vld [vmem:[%s3348_s21 + $0xd8] sm:$0xff]   ;;  %v2956_v21 = vld [vmem:[%s3348_s21 + $0xd0] sm:$0xff]  }
  0x3a   : > { %v2949_v14 = vld [vmem:[%s3348_s21 + $0x20] sm:$0xff]   ;;  %v2953_v18 = vld [vmem:[%s3348_s21 + $0x18] sm:$0xff]   ;;  %v2957_v22 = vld [vmem:[%s3348_s21 + $0x10] sm:$0xff]  }
  0x3b   : > { %2628 = vmatpush3.bf16.msra.mxu0 %v2941_v6  ;;  %v2950_v15 = vld [vmem:[%s3348_s21 + $0xa0] sm:$0xff]   ;;  %v2954_v19 = vld [vmem:[%s3348_s21 + $0x98] sm:$0xff]   ;;  %v2958_v23 = vld [vmem:[%s3348_s21 + $0x90] sm:$0xff]  }
  0x3c   : > { %2650 = vmatpush3.bf16.msra.mxu1 %v2942_v7  ;;  %2629 = vmatprep.subr.bf16.mxu0 %v2943_v8  ;;  %v2959_v24 = vld [vmem:[%s3348_s21 + $0x48] sm:$0xff]   ;;  %v2963_v28 = vld [vmem:[%s3348_s21 + $0x40] sm:$0xff]  }
  0x3d   : > { %2651 = vmatprep.subr.bf16.mxu1 %v2944_v9  ;;  %v2960_v25 = vld [vmem:[%s3348_s21 + $0xc8] sm:$0xff]   ;;  %v2964_v29 = vld [vmem:[%s3348_s21 + $0xc0] sm:$0xff]  }
  0x3e   : > { %v2961_v26 = vld [vmem:[%s3348_s21 + $0x8] sm:$0xff]   ;;  %v2965_v30 = vld [vmem:[%s3348_s21] sm:$0xff]  }
  0x3f   : > { %2630 = vmatpush3.bf16.msra.mxu0 %v2945_v10  ;;  %v2962_v27 = vld [vmem:[%s3348_s21 + $0x88] sm:$0xff]   ;;  %v2966_v31 = vld [vmem:[%s3348_s21 + $0x80] sm:$0xff]  }
  0x40   : > { %2652 = vmatpush3.bf16.msra.mxu1 %v2946_v11  ;;  %2631 = vmatprep.subr.bf16.mxu0 %v2947_v12  ;;  %v2967_v32 = vld [vmem:[%s3580_s0] ss:$16 sps:$4 sm:$0xff]   ;;  %v2969_v33 = vld [vmem:[%s3580_s0 + $0x4] ss:$16 sps:$4 sm:$0xff]   ;;  %v2970_v34 = vld [vmem:[%s3580_s0 + $0x8] ss:$16 sps:$4 sm:$0xff]  }
  0x41   : > { %2653 = vmatprep.subr.bf16.mxu1 %v2948_v13  ;;  %v2972_v35 = vld [vmem:[%s3580_s0 + $0xc] ss:$16 sps:$4 sm:$0xff]   ;;  %676 = vmatprep.mubr.bf16.mxu0 %v2969_v33 }
  0x42   : > { %717 = vmatprep.mubr.bf16.mxu1 %v2972_v35 }
  0x43   : > { %2632 = vmatpush3.bf16.msra.mxu0 %v2949_v14 }
  0x44   : > { %2654 = vmatpush3.bf16.msra.mxu1 %v2950_v15  ;;  %2633 = vmatprep.subr.bf16.mxu0 %v2951_v16 }
  0x45   : > { %2655 = vmatprep.subr.bf16.mxu1 %v2952_v17 }
  0x47   : > { %2634 = vmatpush3.bf16.msra.mxu0 %v2953_v18 }
  0x48   : > { %2656 = vmatpush3.bf16.msra.mxu1 %v2954_v19  ;;  %2635 = vmatprep.subr.bf16.mxu0 %v2955_v20 }
  0x49   : > { %2657 = vmatprep.subr.bf16.mxu1 %v2956_v21 }
  0x4b   : > { %2636 = vmatpush3.bf16.msra.mxu0 %v2957_v22 }
  0x4c   : > { %2658 = vmatpush3.bf16.msra.mxu1 %v2958_v23  ;;  %2637 = vmatprep.subr.bf16.mxu0 %v2959_v24 }
  0x4d   : > { %2659 = vmatprep.subr.bf16.mxu1 %v2960_v25 }
  0x4f   : > { %2638 = vmatpush3.bf16.msra.mxu0 %v2961_v26 }
  0x50   : > { %2660 = vmatpush3.bf16.msra.mxu1 %v2962_v27  ;;  %2639 = vmatprep.subr.bf16.mxu0 %v2963_v28 }
  0x51   : > { %2661 = vmatprep.subr.bf16.mxu1 %v2964_v29 }
  0x53   : > { %2640 = vmatpush3.bf16.msra.mxu0 %v2965_v30 }
  0x54   : > { %2662 = vmatpush3.bf16.msra.mxu1 %v2966_v31 }
  0x56   : > { %677 = vmatmul.mubr.bf16.vlgmr.msra.gmra.mxu0 %v2967_v32 }
  0x57   : > { %718 = vmatmul.mubr.bf16.vlgmr.msra.gmra.mxu1 %v2970_v34 }
 0x116   : > { %v2641_v36 = vpop.f32.mrf.mxu0 }
 0x117   : > { %v2663_v37 = vpop.f32.mrf.mxu1 }
 0x118   : > { %v2642_v38 = vpop.f32.mrf.mxu0 }
 0x119   : > { %v2643_v39 = vadd.f32 %v2642_v38, %v2641_v36  ;;  %v2664_v40 = vpop.f32.mrf.mxu1 }
 0x11a   : > { %v2665_v41 = vadd.f32 %v2664_v40, %v2663_v37  ;;  %v2644_v42 = vpop.f32.mrf.mxu0 }
 0x11b   : > { %v2666_v43 = vpop.f32.mrf.mxu1 }
 0x11c   : > { %v720_v44 = vadd.f32 %v2665_v41, %v2643_v39  ;;  %v2645_v45 = vpop.f32.mrf.mxu0 }
 0x11d   : > { %v2646_v46 = vadd.f32 %v2645_v45, %v2644_v42  ;;  %v2667_v47 = vpop.f32.mrf.mxu1 }
 0x11e   : > { %v2619_v48 = vpack.c.bf16 %v720_v44, %v720_v44  ;;  %v2668_v49 = vadd.f32 %v2667_v47, %v2666_v43 }
 0x120   : > { %738 = vst [vmem:[%s737_s29] sm:$0xf] %v2619_v48  ;;  %v723_v50 = vadd.f32 %v2668_v49, %v2646_v46 }
 0x122   : > { %v2620_v51 = vpack.c.bf16 %v723_v50, %v723_v50 }
 0x124   : > { %739 = vst [vmem:[%s737_s29 + $0x10] sm:$0xf] %v2620_v51 }
 0x125 PF: > { %p2474_p10 = scmp.ne.s32.totalorder %s3181_s13, 1 }
 0x126   : > { %s1109_s19 = sshra.s32 (!%p2474_p10), %s3355_s17, 7 }
 0x127   : > { %743 = sbr.rel (%p2474_p10) target bundleno = 747 (0x2eb), region = 68  ;;  %s3439_s24 = sshll.u32 (!%p2474_p10), %s1109_s19, 2 }
 0x128   : > { %s1118_s20 = scalar_lea.vmem (!%p2474_p10), [#allocation2], %s3439_s24  ;;  %s1112_s26 = scalar_lea.vmem (!%p2474_p10), %s3580_s0, %s3439_s24 }
 0x12c   : > { %v2973_v52 = vld [vmem:[%s3348_s21 + $0x78] sm:$0xff]   ;;  %v2977_v56 = vld [vmem:[%s3348_s21 + $0x70] sm:$0xff]   ;;  %v2981_v60 = vld [vmem:[%s3348_s21 + $0x68] sm:$0xff]   ;;  %v3199_v24 = vmov 0.0   ;;  %vm3200_vm0 = vmmov 0   ;;  %vm1132_vm1 = vcmask 130048  }
 0x12d   : > { %v2974_v53 = vld [vmem:[%s3348_s21 + $0xf8] sm:$0xff]   ;;  %2669 = vmatprep.subr.bf16.mxu0 %v2973_v52  ;;  %v2978_v57 = vld [vmem:[%s3348_s21 + $0xf0] sm:$0xff]   ;;  %v2982_v61 = vld [vmem:[%s3348_s21 + $0xe8] sm:$0xff]  }
 0x12e   : > { %v2975_v54 = vld [vmem:[%s3348_s21 + $0x38] sm:$0xff]   ;;  %2691 = vmatprep.subr.bf16.mxu1 %v2974_v53  ;;  %v2979_v58 = vld [vmem:[%s3348_s21 + $0x30] sm:$0xff]   ;;  %v2983_v62 = vld [vmem:[%s3348_s21 + $0x28] sm:$0xff]  }
 0x12f   : > { %v2976_v55 = vld [vmem:[%s3348_s21 + $0xb8] sm:$0xff]   ;;  %2670 = vmatpush3.bf16.msra.mxu0 %v2975_v54  ;;  %v2980_v59 = vld [vmem:[%s3348_s21 + $0xb0] sm:$0xff]   ;;  %v2984_v63 = vld [vmem:[%s3348_s21 + $0xa8] sm:$0xff]  }
 0x130   : > { %2692 = vmatpush3.bf16.msra.mxu1 %v2976_v55  ;;  %2671 = vmatprep.subr.bf16.mxu0 %v2977_v56  ;;  %v2985_v0 = vld [vmem:[%s3348_s21 + $0x60] sm:$0xff]   ;;  %v2989_v4 = vld [vmem:[%s3348_s21 + $0x58] sm:$0xff]   ;;  %v2993_v8 = vld [vmem:[%s3348_s21 + $0x50] sm:$0xff]  }
 0x131   : > { %2693 = vmatprep.subr.bf16.mxu1 %v2978_v57  ;;  %v2986_v1 = vld [vmem:[%s3348_s21 + $0xe0] sm:$0xff]   ;;  %v2990_v5 = vld [vmem:[%s3348_s21 + $0xd8] sm:$0xff]   ;;  %v2994_v9 = vld [vmem:[%s3348_s21 + $0xd0] sm:$0xff]  }
 0x132   : > { %v2987_v2 = vld [vmem:[%s3348_s21 + $0x20] sm:$0xff]   ;;  %v2991_v6 = vld [vmem:[%s3348_s21 + $0x18] sm:$0xff]   ;;  %v2995_v10 = vld [vmem:[%s3348_s21 + $0x10] sm:$0xff]  }
 0x133   : > { %2672 = vmatpush3.bf16.msra.mxu0 %v2979_v58  ;;  %v2988_v3 = vld [vmem:[%s3348_s21 + $0xa0] sm:$0xff]   ;;  %v2992_v7 = vld [vmem:[%s3348_s21 + $0x98] sm:$0xff]   ;;  %v2996_v11 = vld [vmem:[%s3348_s21 + $0x90] sm:$0xff]  }
 0x134   : > { %2694 = vmatpush3.bf16.msra.mxu1 %v2980_v59  ;;  %2673 = vmatprep.subr.bf16.mxu0 %v2981_v60  ;;  %v2997_v12 = vld [vmem:[%s3348_s21 + $0x48] sm:$0xff]   ;;  %v3001_v16 = vld [vmem:[%s3348_s21 + $0x40] sm:$0xff]  }
 0x135   : > { %2695 = vmatprep.subr.bf16.mxu1 %v2982_v61  ;;  %v2998_v13 = vld [vmem:[%s3348_s21 + $0xc8] sm:$0xff]   ;;  %v3002_v17 = vld [vmem:[%s3348_s21 + $0xc0] sm:$0xff]  }
 0x136   : > { %v2999_v14 = vld [vmem:[%s3348_s21 + $0x8] sm:$0xff]   ;;  %v3003_v18 = vld [vmem:[%s3348_s21] sm:$0xff]  }
 0x137   : > { %2674 = vmatpush3.bf16.msra.mxu0 %v2983_v62  ;;  %v3000_v15 = vld [vmem:[%s3348_s21 + $0x88] sm:$0xff]   ;;  %v3004_v19 = vld [vmem:[%s3348_s21 + $0x80] sm:$0xff]  }
 0x138   : > { %2696 = vmatpush3.bf16.msra.mxu1 %v2984_v63  ;;  %2675 = vmatprep.subr.bf16.mxu0 %v2985_v0  ;;  %v3005_v20 = vld [vmem:[#allocation2] ss:$16 sps:$4 sm:$0xff]   ;;  %v3007_v21 = vld [vmem:[#allocation2 + $0x4] ss:$16 sps:$4 sm:$0xff]   ;;  %v3008_v22 = vld [vmem:[#allocation2 + $0x8] ss:$16 sps:$4 sm:$0xff]  }
 0x139   : > { %2697 = vmatprep.subr.bf16.mxu1 %v2986_v1  ;;  %v3010_v23 = vld [vmem:[#allocation2 + $0xc] ss:$16 sps:$4 sm:$0xff]   ;;  %1056 = vmatprep.mubr.bf16.mxu0 %v3007_v21  ;;  %v3011_v25 = vld [vmem:[%s1118_s20] ss:$16 sps:$4 sm:$0xff]   ;;  %s1296_s20 = scalar_lea.vmem [#allocation3], %s3439_s24 }
 0x13a   : > { %1097 = vmatprep.mubr.bf16.mxu1 %v3010_v23  ;;  %v3012_v26 = vld [vmem:[%s1112_s26] ss:$16 sps:$4 sm:$0xff]  }
 0x13b   : > { %2676 = vmatpush3.bf16.msra.mxu0 %v2987_v2  ;;  %v3013_v27 = vld [vmem:[%s3583_s3] sm:$0xff]  }
 0x13c   : > { %2698 = vmatpush3.bf16.msra.mxu1 %v2988_v3  ;;  %2677 = vmatprep.subr.bf16.mxu0 %v2989_v4  ;;  %v3014_v28 = vld [vmem:[%s3582_s2] sm:$0xff]  }
 0x13d   : > { %2699 = vmatprep.subr.bf16.mxu1 %v2990_v5  ;;  %v3015_v44 = vld [vmem:[%s3584_s4] sm:$0xff]  }
 0x13f   : > { %2678 = vmatpush3.bf16.msra.mxu0 %v2991_v6 }
 0x140   : > { %2700 = vmatpush3.bf16.msra.mxu1 %v2992_v7  ;;  %2679 = vmatprep.subr.bf16.mxu0 %v2993_v8 }
 0x141   : > { %2701 = vmatprep.subr.bf16.mxu1 %v2994_v9 }
 0x143   : > { %2680 = vmatpush3.bf16.msra.mxu0 %v2995_v10 }
 0x144   : > { %2702 = vmatpush3.bf16.msra.mxu1 %v2996_v11  ;;  %2681 = vmatprep.subr.bf16.mxu0 %v2997_v12 }
 0x145   : > { %2703 = vmatprep.subr.bf16.mxu1 %v2998_v13 }
 0x147   : > { %2682 = vmatpush3.bf16.msra.mxu0 %v2999_v14 }
 0x148   : > { %2704 = vmatpush3.bf16.msra.mxu1 %v3000_v15  ;;  %2683 = vmatprep.subr.bf16.mxu0 %v3001_v16 }
 0x149   : > { %2705 = vmatprep.subr.bf16.mxu1 %v3002_v17 }
 0x14b   : > { %2684 = vmatpush3.bf16.msra.mxu0 %v3003_v18 }
 0x14c   : > { %2706 = vmatpush3.bf16.msra.mxu1 %v3004_v19  ;;  %2815 = vmatprep.subr.bf16.mxu0 %v3199_v24 }
 0x14d   : > { %2821 = vmatprep.subr.bf16.mxu1 %v3199_v24 }
 0x14e   : > { %1057 = vmatmul.mubr.bf16.vlgmr.msra.gmra.mxu0 %v3005_v20 }
 0x14f   : > { %1098 = vmatmul.mubr.bf16.vlgmr.msra.gmra.mxu1 %v3008_v22  ;;  %2816 = vmatpush3.bf16.msra.mxu0 %v3011_v25 }
 0x150   : > { %2817 = vmatprep.mubr.msk.bf16.mxu0 %vm3200_vm0, %v3199_v24  ;;  %2822 = vmatpush3.bf16.msra.mxu1 %v3012_v26 }
 0x151   : > { %2823 = vmatprep.mubr.msk.bf16.mxu1 %vm3200_vm0, %v3199_v24  ;;  %2827 = vmatprep.subr.bf16.mxu0 %v3199_v24 }
 0x156   : > { %2818 = vmatmul.mubr.msk.bf16.vlgmr.msra.gmra.mxu0 %vm1132_vm1, %v3013_v27 }
 0x157   : > { %2824 = vmatmul.mubr.msk.bf16.vlgmr.msra.gmra.mxu1 %vm1132_vm1, %v3014_v28  ;;  %2829 = vmatprep.mubr.msk.bf16.mxu0 %vm3200_vm0, %v3199_v24 }
 0x20e   : > { %v2685_v29 = vpop.f32.mrf.mxu0 }
 0x20f   : > { %v2707_v30 = vpop.f32.mrf.mxu1 }
 0x210   : > { %v2686_v31 = vpop.f32.mrf.mxu0 }
 0x211   : > { %v2708_v32 = vpop.f32.mrf.mxu1  ;;  %v2687_v35 = vadd.f32 %v2686_v31, %v2685_v29 }
 0x212   : > { %v2688_v33 = vpop.f32.mrf.mxu0  ;;  %v2709_v36 = vadd.f32 %v2708_v32, %v2707_v30 }
 0x213   : > { %v2710_v34 = vpop.f32.mrf.mxu1 }
 0x214   : > { %v2689_v37 = vpop.f32.mrf.mxu0  ;;  %v1100_v41 = vadd.f32 %v2709_v36, %v2687_v35 }
 0x215   : > { %v2690_v38 = vadd.f32 %v2689_v37, %v2688_v33  ;;  %v2711_v39 = vpop.f32.mrf.mxu1 }
 0x216   : > { %v2712_v40 = vadd.f32 %v2711_v39, %v2710_v34  ;;  %v1170_v45 = vpop.f32.mrf.mxu0 }
 0x217   : > { %v1225_v46 = vpop.f32.mrf.mxu1 }
 0x218   : > { %v1103_v42 = vadd.f32 %v2712_v40, %v2690_v38  ;;  %v2819_v47 = vpop.f32.mrf.mxu0  ;;  %v1226_v48 = vadd.f32 %v1225_v46, %v1170_v45 }
 0x219   : > { %v2825_v49 = vpop.f32.mrf.mxu1 }
 0x21a   : > { %v1106_v43 = vpack.c.bf16 %v1103_v42, %v1100_v41  ;;  %v1173_v50 = vpop.f32.mrf.mxu0 }
 0x21b   : > { %v1228_v51 = vpop.f32.mrf.mxu1 }
 0x21c   : > { %2828 = vmatpush3.bf16.msra.mxu0 %v1106_v43  ;;  %v2820_v52 = vpop.f32.mrf.mxu0  ;;  %v1229_v53 = vadd.f32 %v1228_v51, %v1173_v50 }
 0x21d   : > { %v2826_v54 = vpop.f32.mrf.mxu1 }
 0x21f   : > { %2830 = vmatmul.mubr.msk.bf16.vlgmr.msra.gmra.mxu0 %vm1132_vm1, %v3015_v44 }
 0x2df   : > { %v1276_v55 = vpop.f32.mrf.mxu0 }
 0x2e0   : > { %v1283_v56 = vadd.f32 %v1276_v55, %v1226_v48 }
 0x2e1   : > { %v2831_v57 = vpop.f32.mrf.mxu0 }
 0x2e2   : > { %v1285_v58 = vmax.f32 %v1283_v56, 0.0 }
 0x2e3   : > { %v1279_v59 = vpop.f32.mrf.mxu0 }
 0x2e4   : > { %v2621_v60 = vpack.c.bf16 %v1285_v58, %v1285_v58  ;;  %v1284_v61 = vadd.f32 %v1279_v59, %v1229_v53 }
 0x2e5   : > { %v2832_v62 = vpop.f32.mrf.mxu0 }
 0x2e6   : > { %1297 = vst [vmem:[%s1296_s20] sm:$0xf] %v2621_v60  ;;  %v1286_v63 = vmax.f32 %v1284_v61, 0.0 }
 0x2e8   : > { %v2622_v0 = vpack.c.bf16 %v1286_v63, %v1286_v63 }
 0x2ea   : > { %1298 = vst [vmem:[%s1296_s20 + $0x10] sm:$0xf] %v2622_v0 }
 0x2eb PF: > { %p2524_p13 = scmp.ne.s32.totalorder %s3181_s13, 2 }
 0x2ec   : > { %s1673_s24 = sshra.s32 (!%p2524_p13), %s3355_s17, 7 }
 0x2ed   : > { %1302 = sbr.rel (%p2524_p13) target bundleno = 995 (0x3e3), region = 72  ;;  %s2563_s27 = sshll.u32 (!%p2524_p13), %s1673_s24, 2 }
 0x2ee   : > { %s1676_s22 = scalar_lea.vmem (!%p2524_p13), [#allocation4], %s2563_s27 }
 0x2f2   : > { %v3016_v1 = vld [vmem:[%s3348_s21 + $0x78] sm:$0xff]   ;;  %v3020_v5 = vld [vmem:[%s3348_s21 + $0x70] sm:$0xff]   ;;  %v3024_v9 = vld [vmem:[%s3348_s21 + $0x68] sm:$0xff]  }
 0x2f3   : > { %v3017_v2 = vld [vmem:[%s3348_s21 + $0xf8] sm:$0xff]   ;;  %2719 = vmatprep.subr.bf16.mxu0 %v3016_v1  ;;  %v3021_v6 = vld [vmem:[%s3348_s21 + $0xf0] sm:$0xff]   ;;  %v3025_v10 = vld [vmem:[%s3348_s21 + $0xe8] sm:$0xff]  }
 0x2f4   : > { %v3018_v3 = vld [vmem:[%s3348_s21 + $0x38] sm:$0xff]   ;;  %2741 = vmatprep.subr.bf16.mxu1 %v3017_v2  ;;  %v3022_v7 = vld [vmem:[%s3348_s21 + $0x30] sm:$0xff]   ;;  %v3026_v11 = vld [vmem:[%s3348_s21 + $0x28] sm:$0xff]  }
 0x2f5   : > { %v3019_v4 = vld [vmem:[%s3348_s21 + $0xb8] sm:$0xff]   ;;  %2720 = vmatpush3.bf16.msra.mxu0 %v3018_v3  ;;  %v3023_v8 = vld [vmem:[%s3348_s21 + $0xb0] sm:$0xff]   ;;  %v3027_v12 = vld [vmem:[%s3348_s21 + $0xa8] sm:$0xff]  }
 0x2f6   : > { %2742 = vmatpush3.bf16.msra.mxu1 %v3019_v4  ;;  %2721 = vmatprep.subr.bf16.mxu0 %v3020_v5  ;;  %v3028_v13 = vld [vmem:[%s3348_s21 + $0x60] sm:$0xff]   ;;  %v3032_v17 = vld [vmem:[%s3348_s21 + $0x58] sm:$0xff]   ;;  %v3036_v21 = vld [vmem:[%s3348_s21 + $0x50] sm:$0xff]  }
 0x2f7   : > { %2743 = vmatprep.subr.bf16.mxu1 %v3021_v6  ;;  %v3029_v14 = vld [vmem:[%s3348_s21 + $0xe0] sm:$0xff]   ;;  %v3033_v18 = vld [vmem:[%s3348_s21 + $0xd8] sm:$0xff]   ;;  %v3037_v22 = vld [vmem:[%s3348_s21 + $0xd0] sm:$0xff]  }
 0x2f8   : > { %v3030_v15 = vld [vmem:[%s3348_s21 + $0x20] sm:$0xff]   ;;  %v3034_v19 = vld [vmem:[%s3348_s21 + $0x18] sm:$0xff]   ;;  %v3038_v23 = vld [vmem:[%s3348_s21 + $0x10] sm:$0xff]  }
 0x2f9   : > { %2722 = vmatpush3.bf16.msra.mxu0 %v3022_v7  ;;  %v3031_v16 = vld [vmem:[%s3348_s21 + $0xa0] sm:$0xff]   ;;  %v3035_v20 = vld [vmem:[%s3348_s21 + $0x98] sm:$0xff]   ;;  %v3039_v24 = vld [vmem:[%s3348_s21 + $0x90] sm:$0xff]  }
 0x2fa   : > { %2744 = vmatpush3.bf16.msra.mxu1 %v3023_v8  ;;  %2723 = vmatprep.subr.bf16.mxu0 %v3024_v9  ;;  %v3040_v25 = vld [vmem:[%s3348_s21 + $0x48] sm:$0xff]   ;;  %v3044_v29 = vld [vmem:[%s3348_s21 + $0x40] sm:$0xff]  }
 0x2fb   : > { %2745 = vmatprep.subr.bf16.mxu1 %v3025_v10  ;;  %v3041_v26 = vld [vmem:[%s3348_s21 + $0xc8] sm:$0xff]   ;;  %v3045_v30 = vld [vmem:[%s3348_s21 + $0xc0] sm:$0xff]  }
 0x2fc   : > { %v3042_v27 = vld [vmem:[%s3348_s21 + $0x8] sm:$0xff]   ;;  %v3046_v31 = vld [vmem:[%s3348_s21] sm:$0xff]  }
 0x2fd   : > { %2724 = vmatpush3.bf16.msra.mxu0 %v3026_v11  ;;  %v3043_v28 = vld [vmem:[%s3348_s21 + $0x88] sm:$0xff]   ;;  %v3047_v32 = vld [vmem:[%s3348_s21 + $0x80] sm:$0xff]  }
 0x2fe   : > { %2746 = vmatpush3.bf16.msra.mxu1 %v3027_v12  ;;  %2725 = vmatprep.subr.bf16.mxu0 %v3028_v13  ;;  %v3048_v33 = vld [vmem:[#allocation3] ss:$16 sps:$4 sm:$0xff]   ;;  %v3050_v34 = vld [vmem:[#allocation3 + $0x4] ss:$16 sps:$4 sm:$0xff]   ;;  %v3051_v35 = vld [vmem:[#allocation3 + $0x8] ss:$16 sps:$4 sm:$0xff]  }
 0x2ff   : > { %2747 = vmatprep.subr.bf16.mxu1 %v3029_v14  ;;  %v3053_v36 = vld [vmem:[#allocation3 + $0xc] ss:$16 sps:$4 sm:$0xff]   ;;  %1615 = vmatprep.mubr.bf16.mxu0 %v3050_v34 }
 0x300   : > { %1656 = vmatprep.mubr.bf16.mxu1 %v3053_v36 }
 0x301   : > { %2726 = vmatpush3.bf16.msra.mxu0 %v3030_v15 }
 0x302   : > { %2748 = vmatpush3.bf16.msra.mxu1 %v3031_v16  ;;  %2727 = vmatprep.subr.bf16.mxu0 %v3032_v17 }
 0x303   : > { %2749 = vmatprep.subr.bf16.mxu1 %v3033_v18 }
 0x305   : > { %2728 = vmatpush3.bf16.msra.mxu0 %v3034_v19 }
 0x306   : > { %2750 = vmatpush3.bf16.msra.mxu1 %v3035_v20  ;;  %2729 = vmatprep.subr.bf16.mxu0 %v3036_v21 }
 0x307   : > { %2751 = vmatprep.subr.bf16.mxu1 %v3037_v22 }
 0x309   : > { %2730 = vmatpush3.bf16.msra.mxu0 %v3038_v23 }
 0x30a   : > { %2752 = vmatpush3.bf16.msra.mxu1 %v3039_v24  ;;  %2731 = vmatprep.subr.bf16.mxu0 %v3040_v25 }
 0x30b   : > { %2753 = vmatprep.subr.bf16.mxu1 %v3041_v26 }
 0x30d   : > { %2732 = vmatpush3.bf16.msra.mxu0 %v3042_v27 }
 0x30e   : > { %2754 = vmatpush3.bf16.msra.mxu1 %v3043_v28  ;;  %2733 = vmatprep.subr.bf16.mxu0 %v3044_v29 }
 0x30f   : > { %2755 = vmatprep.subr.bf16.mxu1 %v3045_v30 }
 0x311   : > { %2734 = vmatpush3.bf16.msra.mxu0 %v3046_v31 }
 0x312   : > { %2756 = vmatpush3.bf16.msra.mxu1 %v3047_v32 }
 0x314   : > { %1616 = vmatmul.mubr.bf16.vlgmr.msra.gmra.mxu0 %v3048_v33 }
 0x315   : > { %1657 = vmatmul.mubr.bf16.vlgmr.msra.gmra.mxu1 %v3051_v35 }
 0x3d4   : > { %v2735_v37 = vpop.f32.mrf.mxu0 }
 0x3d5   : > { %v2757_v38 = vpop.f32.mrf.mxu1 }
 0x3d6   : > { %v2736_v39 = vpop.f32.mrf.mxu0 }
 0x3d7   : > { %v2737_v40 = vadd.f32 %v2736_v39, %v2735_v37  ;;  %v2758_v41 = vpop.f32.mrf.mxu1 }
 0x3d8   : > { %v2759_v42 = vadd.f32 %v2758_v41, %v2757_v38  ;;  %v2738_v43 = vpop.f32.mrf.mxu0 }
 0x3d9   : > { %v2760_v44 = vpop.f32.mrf.mxu1 }
 0x3da   : > { %v1659_v45 = vadd.f32 %v2759_v42, %v2737_v40  ;;  %v2739_v46 = vpop.f32.mrf.mxu0 }
 0x3db   : > { %v2740_v47 = vadd.f32 %v2739_v46, %v2738_v43  ;;  %v2761_v48 = vpop.f32.mrf.mxu1 }
 0x3dc   : > { %v2623_v49 = vpack.c.bf16 %v1659_v45, %v1659_v45  ;;  %v2762_v50 = vadd.f32 %v2761_v48, %v2760_v44 }
 0x3de   : > { %1677 = vst [vmem:[%s1676_s22] sm:$0xf] %v2623_v49  ;;  %v1662_v51 = vadd.f32 %v2762_v50, %v2740_v47 }
 0x3e0   : > { %v2624_v52 = vpack.c.bf16 %v1662_v51, %v1662_v51 }
 0x3e2   : > { %1678 = vst [vmem:[%s1676_s22 + $0x10] sm:$0xf] %v2624_v52 }
 0x3e3 PF: > { %p2564_p0 = scmp.ne.s32.totalorder %s3181_s13, 3 }
 0x3e4   : > { %s2048_s13 = sshra.s32 (!%p2564_p0), %s3355_s17, 7 }
 0x3e5   : > { %1682 = sbr.rel (%p2564_p0) target bundleno = 1447 (0x5a7), region = 76  ;;  %s2601_s26 = sshll.u32 (!%p2564_p0), %s2048_s13, 2 }
 0x3e6   : > { %s2057_s28 = scalar_lea.vmem (!%p2564_p0), [#allocation4], %s2601_s26  ;;  %s2051_s14 = scalar_lea.vmem (!%p2564_p0), [#allocation3], %s2601_s26 }
 0x3e7   : > { %s2227_s20 = scalar_lea.vmem (!%p2564_p0), %s3580_s0, %s2601_s26 }
 0x3ea   : > { %v3054_v53 = vld [vmem:[%s3348_s21 + $0x78] sm:$0xff]   ;;  %v3058_v57 = vld [vmem:[%s3348_s21 + $0x70] sm:$0xff]   ;;  %v3062_v61 = vld [vmem:[%s3348_s21 + $0x68] sm:$0xff]   ;;  %v3201_v25 = vmov 0.0   ;;  %vm3202_vm2 = vmmov 0   ;;  %vm2071_vm3 = vcmask 130048  }
 0x3eb   : > { %v3055_v54 = vld [vmem:[%s3348_s21 + $0xf8] sm:$0xff]   ;;  %2763 = vmatprep.subr.bf16.mxu0 %v3054_v53  ;;  %v3059_v58 = vld [vmem:[%s3348_s21 + $0xf0] sm:$0xff]   ;;  %v3063_v62 = vld [vmem:[%s3348_s21 + $0xe8] sm:$0xff]  }
 0x3ec   : > { %v3056_v55 = vld [vmem:[%s3348_s21 + $0x38] sm:$0xff]   ;;  %2785 = vmatprep.subr.bf16.mxu1 %v3055_v54  ;;  %v3060_v59 = vld [vmem:[%s3348_s21 + $0x30] sm:$0xff]   ;;  %v3064_v63 = vld [vmem:[%s3348_s21 + $0x28] sm:$0xff]  }
 0x3ed   : > { %v3057_v56 = vld [vmem:[%s3348_s21 + $0xb8] sm:$0xff]   ;;  %2764 = vmatpush3.bf16.msra.mxu0 %v3056_v55  ;;  %v3061_v60 = vld [vmem:[%s3348_s21 + $0xb0] sm:$0xff]   ;;  %v3065_v0 = vld [vmem:[%s3348_s21 + $0xa8] sm:$0xff]  }
 0x3ee   : > { %2786 = vmatpush3.bf16.msra.mxu1 %v3057_v56  ;;  %2765 = vmatprep.subr.bf16.mxu0 %v3058_v57  ;;  %v3066_v1 = vld [vmem:[%s3348_s21 + $0x60] sm:$0xff]   ;;  %v3070_v5 = vld [vmem:[%s3348_s21 + $0x58] sm:$0xff]   ;;  %v3074_v9 = vld [vmem:[%s3348_s21 + $0x50] sm:$0xff]  }
 0x3ef   : > { %2787 = vmatprep.subr.bf16.mxu1 %v3059_v58  ;;  %v3067_v2 = vld [vmem:[%s3348_s21 + $0xe0] sm:$0xff]   ;;  %v3071_v6 = vld [vmem:[%s3348_s21 + $0xd8] sm:$0xff]   ;;  %v3075_v10 = vld [vmem:[%s3348_s21 + $0xd0] sm:$0xff]  }
 0x3f0   : > { %v3068_v3 = vld [vmem:[%s3348_s21 + $0x20] sm:$0xff]   ;;  %v3072_v7 = vld [vmem:[%s3348_s21 + $0x18] sm:$0xff]   ;;  %v3076_v11 = vld [vmem:[%s3348_s21 + $0x10] sm:$0xff]  }
 0x3f1   : > { %2766 = vmatpush3.bf16.msra.mxu0 %v3060_v59  ;;  %v3069_v4 = vld [vmem:[%s3348_s21 + $0xa0] sm:$0xff]   ;;  %v3073_v8 = vld [vmem:[%s3348_s21 + $0x98] sm:$0xff]   ;;  %v3077_v12 = vld [vmem:[%s3348_s21 + $0x90] sm:$0xff]  }
 0x3f2   : > { %2788 = vmatpush3.bf16.msra.mxu1 %v3061_v60  ;;  %2767 = vmatprep.subr.bf16.mxu0 %v3062_v61  ;;  %v3078_v13 = vld [vmem:[%s3348_s21 + $0x48] sm:$0xff]   ;;  %v3082_v17 = vld [vmem:[%s3348_s21 + $0x40] sm:$0xff]  }
 0x3f3   : > { %2789 = vmatprep.subr.bf16.mxu1 %v3063_v62  ;;  %v3079_v14 = vld [vmem:[%s3348_s21 + $0xc8] sm:$0xff]   ;;  %v3083_v18 = vld [vmem:[%s3348_s21 + $0xc0] sm:$0xff]  }
 0x3f4   : > { %v3080_v15 = vld [vmem:[%s3348_s21 + $0x8] sm:$0xff]   ;;  %v3084_v19 = vld [vmem:[%s3348_s21] sm:$0xff]  }
 0x3f5   : > { %2768 = vmatpush3.bf16.msra.mxu0 %v3064_v63  ;;  %v3081_v16 = vld [vmem:[%s3348_s21 + $0x88] sm:$0xff]   ;;  %v3085_v20 = vld [vmem:[%s3348_s21 + $0x80] sm:$0xff]  }
 0x3f6   : > { %2790 = vmatpush3.bf16.msra.mxu1 %v3065_v0  ;;  %2769 = vmatprep.subr.bf16.mxu0 %v3066_v1  ;;  %v3086_v21 = vld [vmem:[#allocation4] ss:$16 sps:$4 sm:$0xff]   ;;  %v3088_v22 = vld [vmem:[#allocation4 + $0x4] ss:$16 sps:$4 sm:$0xff]   ;;  %v3089_v23 = vld [vmem:[#allocation4 + $0x8] ss:$16 sps:$4 sm:$0xff]  }
 0x3f7   : > { %2791 = vmatprep.subr.bf16.mxu1 %v3067_v2  ;;  %v3091_v24 = vld [vmem:[#allocation4 + $0xc] ss:$16 sps:$4 sm:$0xff]   ;;  %1995 = vmatprep.mubr.bf16.mxu0 %v3088_v22  ;;  %v3092_v26 = vld [vmem:[%s2057_s28] ss:$16 sps:$4 sm:$0xff]  }
 0x3f8   : > { %2036 = vmatprep.mubr.bf16.mxu1 %v3091_v24  ;;  %v3093_v27 = vld [vmem:[%s2051_s14] ss:$16 sps:$4 sm:$0xff]  }
 0x3f9   : > { %2770 = vmatpush3.bf16.msra.mxu0 %v3068_v3  ;;  %v3094_v28 = vld [vmem:[%s3586_s6] sm:$0x3f]  }
 0x3fa   : > { %2792 = vmatpush3.bf16.msra.mxu1 %v3069_v4  ;;  %2771 = vmatprep.subr.bf16.mxu0 %v3070_v5  ;;  %v3095_v29 = vld [vmem:[%s3585_s5] sm:$0x3f]  }
 0x3fb   : > { %2793 = vmatprep.subr.bf16.mxu1 %v3071_v6  ;;  %v3096_v30 = vld [vmem:[%s2227_s20] ss:$16 sps:$4 sm:$0xff]  }
 0x3fc   : > { %v3098_v31 = vld [vmem:[%s3588_s8] sm:$0x3f]  }
 0x3fd   : > { %2772 = vmatpush3.bf16.msra.mxu0 %v3072_v7  ;;  %v3097_v47 = vld [vmem:[%s3587_s7] sm:$0x3f]  }
 0x3fe   : > { %2794 = vmatpush3.bf16.msra.mxu1 %v3073_v8  ;;  %2773 = vmatprep.subr.bf16.mxu0 %v3074_v9 }
 0x3ff   : > { %2795 = vmatprep.subr.bf16.mxu1 %v3075_v10 }
 0x401   : > { %2774 = vmatpush3.bf16.msra.mxu0 %v3076_v11 }
 0x402   : > { %2796 = vmatpush3.bf16.msra.mxu1 %v3077_v12  ;;  %2775 = vmatprep.subr.bf16.mxu0 %v3078_v13 }
 0x403   : > { %2797 = vmatprep.subr.bf16.mxu1 %v3079_v14 }
 0x405   : > { %2776 = vmatpush3.bf16.msra.mxu0 %v3080_v15 }
 0x406   : > { %2798 = vmatpush3.bf16.msra.mxu1 %v3081_v16  ;;  %2777 = vmatprep.subr.bf16.mxu0 %v3082_v17 }
 0x407   : > { %2799 = vmatprep.subr.bf16.mxu1 %v3083_v18 }
 0x409   : > { %2778 = vmatpush3.bf16.msra.mxu0 %v3084_v19 }
 0x40a   : > { %2800 = vmatpush3.bf16.msra.mxu1 %v3085_v20  ;;  %2833 = vmatprep.subr.bf16.mxu0 %v3201_v25 }
 0x40b   : > { %2839 = vmatprep.subr.bf16.mxu1 %v3201_v25 }
 0x40c   : > { %1996 = vmatmul.mubr.bf16.vlgmr.msra.gmra.mxu0 %v3086_v21 }
 0x40d   : > { %2037 = vmatmul.mubr.bf16.vlgmr.msra.gmra.mxu1 %v3089_v23  ;;  %2834 = vmatpush3.bf16.msra.mxu0 %v3092_v26 }
 0x40e   : > { %2835 = vmatprep.mubr.msk.bf16.mxu0 %vm3202_vm2, %v3201_v25  ;;  %2840 = vmatpush3.bf16.msra.mxu1 %v3093_v27 }
 0x40f   : > { %2841 = vmatprep.mubr.msk.bf16.mxu1 %vm3202_vm2, %v3201_v25  ;;  %2845 = vmatprep.subr.bf16.mxu0 %v3201_v25 }
 0x410   : > { %2851 = vmatprep.subr.bf16.mxu1 %v3201_v25 }
 0x414   : > { %2836 = vmatmul.mubr.msk.bf16.vlgmr.msra.gmra.mxu0 %vm2071_vm3, %v3094_v28 }
 0x415   : > { %2842 = vmatmul.mubr.msk.bf16.vlgmr.msra.gmra.mxu1 %vm2071_vm3, %v3095_v29  ;;  %2847 = vmatprep.mubr.msk.bf16.mxu0 %vm3202_vm2, %v3201_v25 }
 0x416   : > { %2853 = vmatprep.mubr.msk.bf16.mxu1 %vm3202_vm2, %v3201_v25  ;;  %2852 = vmatpush3.bf16.msra.mxu1 %v3096_v30 }
 0x41d   : > { %2854 = vmatmul.mubr.msk.bf16.vlgmr.msra.gmra.mxu1 %vm2071_vm3, %v3098_v31 }
 0x4cc   : > { %v2779_v32 = vpop.f32.mrf.mxu0 }
 0x4cd   : > { %v2801_v33 = vpop.f32.mrf.mxu1 }
 0x4ce   : > { %v2780_v34 = vpop.f32.mrf.mxu0 }
 0x4cf   : > { %v2802_v35 = vpop.f32.mrf.mxu1  ;;  %v2781_v38 = vadd.f32 %v2780_v34, %v2779_v32 }
 0x4d0   : > { %v2782_v36 = vpop.f32.mrf.mxu0  ;;  %v2803_v39 = vadd.f32 %v2802_v35, %v2801_v33 }
 0x4d1   : > { %v2804_v37 = vpop.f32.mrf.mxu1 }
 0x4d2   : > { %v2783_v40 = vpop.f32.mrf.mxu0  ;;  %v2039_v44 = vadd.f32 %v2803_v39, %v2781_v38 }
 0x4d3   : > { %v2784_v41 = vadd.f32 %v2783_v40, %v2782_v36  ;;  %v2805_v42 = vpop.f32.mrf.mxu1 }
 0x4d4   : > { %v2806_v43 = vadd.f32 %v2805_v42, %v2804_v37  ;;  %v2109_v48 = vpop.f32.mrf.mxu0 }
 0x4d5   : > { %v2164_v49 = vpop.f32.mrf.mxu1 }
 0x4d6   : > { %v2042_v45 = vadd.f32 %v2806_v43, %v2784_v41  ;;  %v2837_v50 = vpop.f32.mrf.mxu0  ;;  %v2165_v51 = vadd.f32 %v2164_v49, %v2109_v48 }
 0x4d7   : > { %v2843_v52 = vpop.f32.mrf.mxu1 }
 0x4d8   : > { %v2045_v46 = vpack.c.bf16 %v2042_v45, %v2039_v44  ;;  %v2112_v53 = vpop.f32.mrf.mxu0 }
 0x4d9   : > { %v2167_v54 = vpop.f32.mrf.mxu1 }
 0x4da   : > { %2846 = vmatpush3.bf16.msra.mxu0 %v2045_v46  ;;  %v2838_v55 = vpop.f32.mrf.mxu0  ;;  %v2168_v56 = vadd.f32 %v2167_v54, %v2112_v53 }
 0x4db   : > { %v2844_v57 = vpop.f32.mrf.mxu1 }
 0x4dd   : > { %2848 = vmatmul.mubr.msk.bf16.vlgmr.msra.gmra.mxu0 %vm2071_vm3, %v3097_v47  ;;  %v2278_v58 = vpop.f32.mrf.mxu1 }
 0x4df   : > { %v2855_v59 = vpop.f32.mrf.mxu1 }
 0x4e1   : > { %v2281_v60 = vpop.f32.mrf.mxu1 }
 0x4e3   : > { %v2856_v61 = vpop.f32.mrf.mxu1 }
 0x59d   : > { %v2215_v62 = vpop.f32.mrf.mxu0 }
 0x59e   : > { %v2222_v63 = vadd.f32 %v2215_v62, %v2165_v51 }
 0x59f   : > { %v2849_v0 = vpop.f32.mrf.mxu0 }
 0x5a0   : > { %v2285_v1 = vadd.f32 %v2278_v58, %v2222_v63 }
 0x5a1   : > { %v2218_v2 = vpop.f32.mrf.mxu0 }
 0x5a2   : > { %2287 = vst [vmem:[%s3357_s18] sm:$0xff] %v2285_v1  ;;  %v2223_v3 = vadd.f32 %v2218_v2, %v2168_v56 }
 0x5a3   : > { %v2850_v4 = vpop.f32.mrf.mxu0 }
 0x5a4   : > { %v2286_v5 = vadd.f32 %v2281_v60, %v2223_v3 }
 0x5a6   : > { %2288 = vst [vmem:[%s3357_s18 + $0x8] sm:$0xf] %v2286_v5 }
 0x5a7 PF: > { %2295 = sbr.rel (!%p3324_p11) target bundleno = 1455 (0x5af), region = 80  ;;  %s2616_s26 = sshll.u32 (%p3324_p11), %s3177_s12, 3 }
 0x5a8   : > { %s2297_s21 = scalar_lea.vmem (%p3324_p11), %s3589_s9, %s2616_s26 }
 0x5a9   : > { %v2328_v6 = vld [vmem:[%s3357_s18] sm:$0xff] (%p3324_p11) }
 0x5aa   : > { %2329 = vst [vmem:[%s2297_s21] sm:$0xff] (%p3324_p11), %v2328_v6 }
 0x5ad   : > { %v2330_v7 = vld [vmem:[%s3357_s18 + $0x8] sm:$0xff] }
 0x5ae   : > { %2331 = vst [vmem:[%s2297_s21 + $0x20] sm:$0xff] %v2330_v7 }
 0x5af PF: > { %s22_s16 = sadd.s32 1, %s3193_s16   ;;  %s3601_s12 = sld [smem:[#allocation9_spill]] }
 0x5b0   : > { %p19_p1 = scmp.ge.s32.totalorder %s22_s16, 18   ;;  %s3602_s13 = sld [smem:[#allocation10_spill]] }
 0x5b1   : > { %s3603_s14 = sld [smem:[#allocation11_spill]]  ;;  %s3605_s30 = smov %s3169_s10 }
 0x5b2   : > { %s3604_s15 = sld [smem:[#allocation12_spill]]  ;;  %s3606_s10 = smov %s3173_s11 }
 0x5b3   : > { %s3607_s11 = smov %s3314_s23  ;;  %21 = sbr.rel (!%p19_p1) target bundleno = 5 (0x5), region = 158 }
 0x5b8   :  { %2347 = vsyncpa [#allocation6], 1 }
 0x5b9   :  { %2349 = vsyncpa [#allocation6 + $0x1], 1 }

</bundles_post_ra>
